<compile_context>
chip_gen: v7x
topology: tpu7x:2x2x1
jax: 0.10.0
libtpu: 0.0.40
codegen_flags: <defaults>
</compile_context>

<pallas_src>
import jax
import jax.numpy as jnp
from jax.experimental import pallas as pl
from jax.experimental.pallas import tpu as pltpu

# TODO(synk): backbone (external pretrained net loaded via torch.hub) has no
# Pallas equivalent; the kernel consumes its [B, 1280] output features.

NUM_CLASSES = 4
FEAT_IN = 1280          # backbone output width
FC_OUT = 256            # self.fc output width
HEAD_OUT = NUM_CLASSES + 1
HEAD_PAD = 128          # lane-padded head width (multiple of 128)
TB_MAX = 256            # max batch-tile rows per grid step (fits v7x 64 MiB VMEM
                        # comfortably: 2x double-buffered f32 feature tiles
                        # + ~0.7 MB bf16 resident weights << 32 MiB scoped limit)


def _round_up(x, m):
    return ((x + m - 1) // m) * m


def _fused_head_kernel(x_ref, wfc_ref, bfc_ref, wh_ref, bh_ref,
                       out_ref, feat_ref):
    """Fused fc + head:  feat = x @ Wfc + bfc ;  out = feat @ Wh + bh."""
    x = x_ref[...]                                      # [TB, 1280] f32
    wfc = wfc_ref[...].astype(jnp.float32)              # bf16 -> f32 (in vregs)
    feat = jnp.dot(x, wfc, preferred_element_type=jnp.float32) + bfc_ref[...]
    feat_ref[...] = feat                                # [TB, 256]  (second return)
    wh = wh_ref[...].astype(jnp.float32)                # bf16 -> f32
    out_ref[...] = jnp.dot(feat, wh,
                           preferred_element_type=jnp.float32) + bh_ref[...]


def prepare_params(w_fc, b_fc, w_head, b_head):
    """One-time parameter preparation (hoisted out of the forward path).

    Weights are stored transposed vs. PyTorch ([in, out]) and cast to bf16;
    head weight/bias are zero-padded to a lane-dense 128-wide slab.
    """
    w_fc_bf16 = w_fc.astype(jnp.bfloat16)                          # [1280, 256]
    b_fc_2d = b_fc.reshape(1, FC_OUT).astype(jnp.float32)          # [1, 256]
    w_head_p = (jnp.zeros((FC_OUT, HEAD_PAD), jnp.bfloat16)
                .at[:, :HEAD_OUT].set(w_head.astype(jnp.bfloat16)))  # [256, 128]
    b_head_p = (jnp.zeros((1, HEAD_PAD), jnp.float32)
                .at[:, :HEAD_OUT].set(b_head.astype(jnp.float32)))   # [1, 128]
    return w_fc_bf16, b_fc_2d, w_head_p, b_head_p


def model_forward(features, w_fc_bf16, b_fc_2d, w_head_p, b_head_p):
    """features: [B, 1280] f32.  Returns (output [B, 5], x [B, 256])."""
    B = features.shape[0]

    # Batch tiling: TB rows per grid step, padded to satisfy the (8, 128)
    # sublane constraint and an integral number of tiles.
    Bp = _round_up(B, 8)
    TB = min(Bp, TB_MAX)
    Bp = _round_up(Bp, TB)
    if Bp != B:
        features = jnp.pad(features, ((0, Bp - B), (0, 0)))

    flops = 2 * Bp * FEAT_IN * FC_OUT + 2 * Bp * FC_OUT * HEAD_PAD
    bytes_accessed = (Bp * FEAT_IN * 4                # features in
                      + FEAT_IN * FC_OUT * 2          # w_fc (bf16)
                      + FC_OUT * 4                    # b_fc
                      + FC_OUT * HEAD_PAD * 2         # w_head (bf16, padded)
                      + HEAD_PAD * 4                  # b_head (padded)
                      + Bp * HEAD_PAD * 4             # logits out
                      + Bp * FC_OUT * 4)              # feat out

    out_pad, feat = pl.pallas_call(
        _fused_head_kernel,
        out_shape=(
            jax.ShapeDtypeStruct((Bp, HEAD_PAD), jnp.float32),
            jax.ShapeDtypeStruct((Bp, FC_OUT), jnp.float32),
        ),
        grid_spec=pl.GridSpec(
            grid=(Bp // TB,),
            in_specs=[
                # Batch-tiled activations.
                pl.BlockSpec((TB, FEAT_IN), lambda i: (i, 0)),
                # Weights / biases: same block every step -> VMEM-resident.
                pl.BlockSpec((FEAT_IN, FC_OUT), lambda i: (0, 0)),
                pl.BlockSpec((1, FC_OUT), lambda i: (0, 0)),
                pl.BlockSpec((FC_OUT, HEAD_PAD), lambda i: (0, 0)),
                pl.BlockSpec((1, HEAD_PAD), lambda i: (0, 0)),
            ],
            out_specs=[
                pl.BlockSpec((TB, HEAD_PAD), lambda i: (i, 0)),
                pl.BlockSpec((TB, FC_OUT), lambda i: (i, 0)),
            ],
        ),
        compiler_params=pltpu.CompilerParams(
            dimension_semantics=("parallel",),        # megacore-shardable on v7x
            vmem_limit_bytes=32 * 1024 * 1024,
        ),
        cost_estimate=pl.CostEstimate(
            flops=flops, transcendentals=0, bytes_accessed=bytes_accessed),
    )(features, w_fc_bf16, b_fc_2d, w_head_p, b_head_p)

    output = out_pad[:B, :HEAD_OUT]
    return output, feat[:B]


if __name__ == "__main__":
    key = jax.random.PRNGKey(0)
    k_feat, k_wfc, k_bfc, k_wh, k_bh = jax.random.split(key, 5)

    B = 8  # small batch

    # Backbone output features (stand-in for self.backbone(inputs)).
    features = jax.random.normal(k_feat, (B, FEAT_IN), jnp.float32)

    # Deterministic parameter init (PyTorch Linear default: U(-1/sqrt(fan_in), +)).
    lim_fc = 1.0 / (FEAT_IN ** 0.5)
    w_fc = jax.random.uniform(k_wfc, (FEAT_IN, FC_OUT), jnp.float32,
                              -lim_fc, lim_fc)
    b_fc = jax.random.uniform(k_bfc, (FC_OUT,), jnp.float32, -lim_fc, lim_fc)

    lim_h = 1.0 / (FC_OUT ** 0.5)
    w_head = jax.random.uniform(k_wh, (FC_OUT, HEAD_OUT), jnp.float32,
                                -lim_h, lim_h)
    b_head = jax.random.uniform(k_bh, (HEAD_OUT,), jnp.float32, -lim_h, lim_h)

    # One-time parameter prep (hoisted out of the forward call path).
    params = prepare_params(w_fc, b_fc, w_head, b_head)

    fwd = jax.jit(model_forward)
    output, x = jax.block_until_ready(fwd(features, *params))
    assert output.shape == (B, HEAD_OUT) and x.shape == (B, FC_OUT)

    # Reference 1: exact semantics of the stored (bf16-quantized) weights,
    # evaluated in f32 — should match the kernel tightly.
    w_fc_q = params[0].astype(jnp.float32)
    w_head_q = params[2][:, :HEAD_OUT].astype(jnp.float32)
    x_ref_q = features @ w_fc_q + b_fc
    out_ref_q = x_ref_q @ w_head_q + b_head
    assert jnp.allclose(x, x_ref_q, atol=1e-3, rtol=1e-3)
    assert jnp.allclose(output, out_ref_q, atol=1e-3, rtol=1e-3)

    # Reference 2: original full-f32 weights — loose check on the small
    # bf16 weight-quantization shift.
    x_ref = features @ w_fc + b_fc
    out_ref = x_ref @ w_head + b_head
    assert jnp.allclose(x, x_ref, atol=5e-2, rtol=5e-2)
    assert jnp.allclose(output, out_ref, atol=5e-2, rtol=5e-2)

    print("KERNEL_OK")
</pallas_src>

<mosaic_0001>
module attributes {stable_mosaic.version = 11 : i64} {
  func.func @_fused_head_kernel(%arg0: i32, %arg1: memref<8x1280xf32, #tpu.memory_space<vmem>>, %arg2: memref<1280x256xbf16, #tpu.memory_space<vmem>>, %arg3: memref<1x256xf32, #tpu.memory_space<vmem>>, %arg4: memref<256x128xbf16, #tpu.memory_space<vmem>>, %arg5: memref<1x128xf32, #tpu.memory_space<vmem>>, %arg6: memref<8x128xf32, #tpu.memory_space<vmem>>, %arg7: memref<8x256xf32, #tpu.memory_space<vmem>>) attributes {dimension_semantics = [#tpu.dimension_semantics<parallel>], iteration_bounds = array<i64: 1>, scalar_prefetch = 0 : i64, scratch_operands = 0 : i64, tpu.core_type = #tpu.core_type<tc>, window_params = [{transform_indices = @transform_0, window_bounds = array<i64: 8, 1280>}, {pipeline_mode = #tpu.pipeline_mode<synchronous>, transform_indices = @transform_1, window_bounds = array<i64: 1280, 256>}, {pipeline_mode = #tpu.pipeline_mode<synchronous>, transform_indices = @transform_2, window_bounds = array<i64: 1, 256>}, {pipeline_mode = #tpu.pipeline_mode<synchronous>, transform_indices = @transform_3, window_bounds = array<i64: 256, 128>}, {pipeline_mode = #tpu.pipeline_mode<synchronous>, transform_indices = @transform_4, window_bounds = array<i64: 1, 128>}, {transform_indices = @transform_5, window_bounds = array<i64: 8, 128>}, {transform_indices = @transform_6, window_bounds = array<i64: 8, 256>}]} {
    %c0 = arith.constant 0 : index
    %c0_0 = arith.constant 0 : index
    %0 = vector.load %arg1[%c0, %c0_0] : memref<8x1280xf32, #tpu.memory_space<vmem>>, vector<8x1280xf32>
    %c0_1 = arith.constant 0 : index
    %c0_2 = arith.constant 0 : index
    %1 = vector.load %arg2[%c0_1, %c0_2] : memref<1280x256xbf16, #tpu.memory_space<vmem>>, vector<1280x256xbf16>
    %2 = arith.extf %1 : vector<1280x256xbf16> to vector<1280x256xf32>
    %cst = arith.constant dense<0.000000e+00> : vector<8x256xf32>
    %3 = tpu.matmul %0, %2, %cst {dimension_numbers = #tpu.dot_dimension_numbers<[1], [0], [0], [1], [0, 0, 1, 1], [], []>} : vector<8x1280xf32>, vector<1280x256xf32>, vector<8x256xf32> -> vector<8x256xf32>
    %c0_3 = arith.constant 0 : index
    %c0_4 = arith.constant 0 : index
    %4 = vector.load %arg3[%c0_3, %c0_4] : memref<1x256xf32, #tpu.memory_space<vmem>>, vector<1x256xf32>
    %5 = vector.broadcast %4 : vector<1x256xf32> to vector<8x256xf32>
    %6 = arith.addf %3, %5 : vector<8x256xf32>
    %c0_5 = arith.constant 0 : index
    %c0_6 = arith.constant 0 : index
    %7 = vector.load %arg7[%c0_5, %c0_6] : memref<8x256xf32, #tpu.memory_space<vmem>>, vector<8x256xf32>
    tpu.vector_store %arg7[%c0_5, %c0_6], %6 {strides = array<i32>} : memref<8x256xf32, #tpu.memory_space<vmem>>, vector<8x256xf32>,
    %c0_7 = arith.constant 0 : index
    %c0_8 = arith.constant 0 : index
    %8 = vector.load %arg4[%c0_7, %c0_8] : memref<256x128xbf16, #tpu.memory_space<vmem>>, vector<256x128xbf16>
    %9 = arith.extf %8 : vector<256x128xbf16> to vector<256x128xf32>
    %cst_9 = arith.constant dense<0.000000e+00> : vector<8x128xf32>
    %10 = tpu.matmul %6, %9, %cst_9 {dimension_numbers = #tpu.dot_dimension_numbers<[1], [0], [0], [1], [0, 0, 1, 1], [], []>} : vector<8x256xf32>, vector<256x128xf32>, vector<8x128xf32> -> vector<8x128xf32>
    %c0_10 = arith.constant 0 : index
    %c0_11 = arith.constant 0 : index
    %11 = vector.load %arg5[%c0_10, %c0_11] : memref<1x128xf32, #tpu.memory_space<vmem>>, vector<1x128xf32>
    %12 = vector.broadcast %11 : vector<1x128xf32> to vector<8x128xf32>
    %13 = arith.addf %10, %12 : vector<8x128xf32>
    %c0_12 = arith.constant 0 : index
    %c0_13 = arith.constant 0 : index
    %14 = vector.load %arg6[%c0_12, %c0_13] : memref<8x128xf32, #tpu.memory_space<vmem>>, vector<8x128xf32>
    tpu.vector_store %arg6[%c0_12, %c0_13], %13 {strides = array<i32>} : memref<8x128xf32, #tpu.memory_space<vmem>>, vector<8x128xf32>,
    return
  }
  func.func @transform_0(%arg0: i32) -> (i32, i32) {
    %c0_i32 = arith.constant 0 : i32
    %c0_i32_0 = arith.constant 0 : i32
    return %arg0, %c0_i32 : i32, i32
  }
  func.func @transform_1(%arg0: i32) -> (i32, i32) {
    %c0_i32 = arith.constant 0 : i32
    %c0_i32_0 = arith.constant 0 : i32
    %c0_i32_1 = arith.constant 0 : i32
    return %c0_i32, %c0_i32_0 : i32, i32
  }
  func.func @transform_2(%arg0: i32) -> (i32, i32) {
    %c0_i32 = arith.constant 0 : i32
    %c0_i32_0 = arith.constant 0 : i32
    %c0_i32_1 = arith.constant 0 : i32
    return %c0_i32, %c0_i32_0 : i32, i32
  }
  func.func @transform_3(%arg0: i32) -> (i32, i32) {
    %c0_i32 = arith.constant 0 : i32
    %c0_i32_0 = arith.constant 0 : i32
    %c0_i32_1 = arith.constant 0 : i32
    return %c0_i32, %c0_i32_0 : i32, i32
  }
  func.func @transform_4(%arg0: i32) -> (i32, i32) {
    %c0_i32 = arith.constant 0 : i32
    %c0_i32_0 = arith.constant 0 : i32
    %c0_i32_1 = arith.constant 0 : i32
    return %c0_i32, %c0_i32_0 : i32, i32
  }
  func.func @transform_5(%arg0: i32) -> (i32, i32) {
    %c0_i32 = arith.constant 0 : i32
    %c0_i32_0 = arith.constant 0 : i32
    return %arg0, %c0_i32 : i32, i32
  }
  func.func @transform_6(%arg0: i32) -> (i32, i32) {
    %c0_i32 = arith.constant 0 : i32
    %c0_i32_0 = arith.constant 0 : i32
    return %arg0, %c0_i32 : i32, i32
  }
}

</mosaic_0001>

<bundles_post_ra>
// kernel: model_forward.1
= control target key start
LH: loop header
LB: loop body
LE: loop exit
PB: predicated region body
PF: predicated region fallthrough
CT: control target
= control target key end

     0   :  { %12 = vsyncpa [#allocation3], 0  ;;  %s2208_s0 = inlined_call_operand.hbm [shape: f32[8,1280], index: 0, kind: input, shape index: {}]   ;;  %s2209_s1 = inlined_call_operand.hbm [shape: bf16[1280,256], index: 1, kind: input, shape index: {}]   ;;  %s2210_s2 = inlined_call_operand.vmem [shape: f32[1,256], index: 2, kind: input, shape index: {}]   ;;  %s2211_s3 = inlined_call_operand.hbm [shape: bf16[256,128], index: 3, kind: input, shape index: {}]   ;;  %s2212_s4 = inlined_call_operand.vmem [shape: f32[1,128], index: 4, kind: input, shape index: {}]   ;;  %s2213_s5 = inlined_call_operand.hbm [shape: f32[8,128], index: 5, kind: output, shape index: {0}]   ;;  %s2214_s6 = inlined_call_operand.hbm [shape: f32[8,256], index: 6, kind: output, shape index: {1}]  }
   0x1   :  { %13 = vsyncpa [#allocation6], 0 }
   0x2   :  { %14 = vsyncpa [#allocation4], 0 }
   0x3   :  { %15 = vsyncpa [#allocation10], 0  ;;  %s2098_s21 = smov [#allocation5]   ;;  %s1980_s25 = scalar_lea.hbm %s2209_s1, 20480 }
   0x4   :  { %s31_s22 = sshll.u32 %s2098_s21, 4  ;;  %p1981_p0 = scmp.ne.s32.totalorder %s2209_s1, %s1980_s25  ;;  %s32_s22 = int_to_ptr.vmem [resolvable:$true] %s31_s22 }
   0x5   :  { %p1984_p1 = scmp.lt.u32.totalorder %s1980_s25, %s2209_s1 }
   0x7   :  { %p1986_p2 = pnand %p1984_p1, %p1981_p0 }
   0x9   :  { %1989 = shalt.err (!%p1986_p2)
}
   0xa   :  { %s1990_s30 = scalar_lea.vmem %s32_s22, 20480  ;;  %p1995_p4 = scmp.lt.s32.totalorder %s32_s22, %s32_s22 }
   0xb   :  { %p1991_p3 = scmp.ne.s32.totalorder %s32_s22, %s1990_s30  ;;  %p1996_p5 = scmp.lt.s32.totalorder %s1990_s30, %s1990_s30 }
   0xd   :  { %p1997_p6 = por %p1996_p5, %p1995_p4 }
   0xf   :  { %p1998_p7 = pnand %p1997_p6, %p1991_p3 }
  0x11   :  { %2001 = shalt.err (!%p1998_p7)
}
  0x12   :  { %s2099_s7 = smov 128   ;;  %s2100_s8 = smov 8  }
  0x13   :  { %37 = dma.hbm_to_vmem [thread:$0]  %s2209_s1, 20480, %s32_s22, [#allocation6], %s2099_s7, %s2099_s7, %s2100_s8  }
  0x14   :  { %s2101_s11 = smov [#allocation2]   ;;  %s2102_s13 = smov [#allocation7]  }
  0x15   :  { %s22_s12 = sshll.u32 %s2101_s11, 4  ;;  %s45_s14 = sshll.u32 %s2102_s13, 4  ;;  %s23_s12 = int_to_ptr.vmem [resolvable:$true] %s22_s12  ;;  %s46_s14 = int_to_ptr.vmem [resolvable:$true] %s45_s14 }
  0x16   :  { %s2002_s17 = scalar_lea.hbm %s2208_s0, 1280 }
  0x17   :  { %p2003_p8 = scmp.ne.s32.totalorder %s2208_s0, %s2002_s17  ;;  %p2006_p9 = scmp.lt.u32.totalorder %s2002_s17, %s2208_s0 }
  0x19   :  { %p2008_p10 = pnand %p2006_p9, %p2003_p8 }
  0x1b   :  { %2011 = shalt.err (!%p2008_p10)
}
  0x1c   :  { %s2012_s1 = scalar_lea.vmem %s23_s12, 1280  ;;  %p2017_p12 = scmp.lt.s32.totalorder %s23_s12, %s23_s12 }
  0x1d   :  { %p2013_p11 = scmp.ne.s32.totalorder %s23_s12, %s2012_s1  ;;  %p2018_p13 = scmp.lt.s32.totalorder %s2012_s1, %s2012_s1 }
  0x1f   :  { %p2019_p0 = por %p2018_p13, %p2017_p12 }
  0x21   :  { %p2020_p1 = pnand %p2019_p0, %p2013_p11 }
  0x23   :  { %2023 = shalt.err (!%p2020_p1)
}
  0x24   :  { %25 = dma.hbm_to_vmem [thread:$0]  %s2208_s0, 1280, %s23_s12, [#allocation3]  }
  0x25   :  { %s2024_s26 = scalar_lea.hbm %s2211_s3, 2048 }
  0x26   :  { %p2025_p2 = scmp.ne.s32.totalorder %s2211_s3, %s2024_s26  ;;  %p2028_p3 = scmp.lt.u32.totalorder %s2024_s26, %s2211_s3 }
  0x28   :  { %p2030_p4 = pnand %p2028_p3, %p2025_p2 }
  0x2a   :  { %2033 = shalt.err (!%p2030_p4)
}
  0x2b   :  { %s2034_s7 = scalar_lea.vmem %s46_s14, 2048  ;;  %p2039_p6 = scmp.lt.s32.totalorder %s46_s14, %s46_s14 }
  0x2c   :  { %p2035_p5 = scmp.ne.s32.totalorder %s46_s14, %s2034_s7  ;;  %p2040_p7 = scmp.lt.s32.totalorder %s2034_s7, %s2034_s7 }
  0x2e   :  { %p2041_p8 = por %p2040_p7, %p2039_p6 }
  0x30   :  { %p2042_p9 = pnand %p2041_p8, %p2035_p5 }
  0x32   :  { %2045 = shalt.err (!%p2042_p9)
}
  0x33   :  { %s2103_s0 = smov 64   ;;  %s2104_s8 = smov 4  }
  0x34   :  { %51 = dma.hbm_to_vmem [thread:$0]  %s2211_s3, 2048, %s46_s14, [#allocation6], %s2103_s0, %s2103_s0, %s2104_s8  }
  0x35   :  { %2090 = dma.done.wait [#allocation3], 1280  }
  0x36   :  { %2091 = vsyncadd [#allocation3], 4294966016 }
  0x37   :  { %2092 = dma.done.wait [#allocation6], 22528  }
  0x38   :  { %2093 = vsyncadd [#allocation6], 4294944768  ;;  %v1740_v0 = vld [vmem:[#allocation5 + $0x4] ss:$8 sps:$4 sm:$0xff]   ;;  %v1744_v2 = vld [vmem:[#allocation5] ss:$8 sps:$4 sm:$0xff]  }
  0x39   :  { %v1742_v1 = vld [vmem:[#allocation5 + $0x204] ss:$8 sps:$4 sm:$0xff]   ;;  %1210 = vmatprep.subr.bf16.mxu1 %v1740_v0  ;;  %v1745_v3 = vld [vmem:[#allocation5 + $0x200] ss:$8 sps:$4 sm:$0xff]   ;;  %v1746_v4 = vld [vmem:[#allocation5 + $0x14] ss:$8 sps:$4 sm:$0xff]  }
  0x3a   :  { %1338 = vmatprep.subr.bf16.mxu0 %v1742_v1  ;;  %1212 = vmatpush1.bf16.msra.mxu1 %v1744_v2  ;;  %v1748_v5 = vld [vmem:[#allocation5 + $0x214] ss:$8 sps:$4 sm:$0xff]   ;;  %v1750_v6 = vld [vmem:[#allocation5 + $0x10] ss:$8 sps:$4 sm:$0xff]   ;;  %v1752_v8 = vld [vmem:[#allocation5 + $0x24] ss:$8 sps:$4 sm:$0xff]  }
  0x3b   :  { %1340 = vmatpush1.bf16.msra.mxu0 %v1745_v3  ;;  %1214 = vmatprep.subr.bf16.mxu1 %v1746_v4  ;;  %v1751_v7 = vld [vmem:[#allocation5 + $0x210] ss:$8 sps:$4 sm:$0xff]   ;;  %v1754_v9 = vld [vmem:[#allocation5 + $0x224] ss:$8 sps:$4 sm:$0xff]   ;;  %v1756_v10 = vld [vmem:[#allocation5 + $0x20] ss:$8 sps:$4 sm:$0xff]  }
  0x3c   :  { %1342 = vmatprep.subr.bf16.mxu0 %v1748_v5  ;;  %v1757_v11 = vld [vmem:[#allocation5 + $0x220] ss:$8 sps:$4 sm:$0xff]   ;;  %v1758_v12 = vld [vmem:[#allocation5 + $0x34] ss:$8 sps:$4 sm:$0xff]   ;;  %v1762_v14 = vld [vmem:[#allocation5 + $0x30] ss:$8 sps:$4 sm:$0xff]  }
  0x3d   :  { %v1760_v13 = vld [vmem:[#allocation5 + $0x234] ss:$8 sps:$4 sm:$0xff]   ;;  %v1763_v15 = vld [vmem:[#allocation5 + $0x230] ss:$8 sps:$4 sm:$0xff]   ;;  %v1764_v16 = vld [vmem:[#allocation5 + $0x44] ss:$8 sps:$4 sm:$0xff]  }
  0x3e   :  { %1216 = vmatpush1.bf16.msra.mxu1 %v1750_v6  ;;  %v1766_v17 = vld [vmem:[#allocation5 + $0x244] ss:$8 sps:$4 sm:$0xff]   ;;  %v1768_v18 = vld [vmem:[#allocation5 + $0x40] ss:$8 sps:$4 sm:$0xff]   ;;  %v1770_v20 = vld [vmem:[#allocation5 + $0x54] ss:$8 sps:$4 sm:$0xff]  }
  0x3f   :  { %1344 = vmatpush1.bf16.msra.mxu0 %v1751_v7  ;;  %1218 = vmatprep.subr.bf16.mxu1 %v1752_v8  ;;  %v1769_v19 = vld [vmem:[#allocation5 + $0x240] ss:$8 sps:$4 sm:$0xff]   ;;  %v1772_v21 = vld [vmem:[#allocation5 + $0x254] ss:$8 sps:$4 sm:$0xff]   ;;  %v1774_v22 = vld [vmem:[#allocation5 + $0x50] ss:$8 sps:$4 sm:$0xff]  }
  0x40   :  { %1346 = vmatprep.subr.bf16.mxu0 %v1754_v9  ;;  %v1775_v23 = vld [vmem:[#allocation5 + $0x250] ss:$8 sps:$4 sm:$0xff]   ;;  %v1776_v24 = vld [vmem:[#allocation5 + $0x64] ss:$8 sps:$4 sm:$0xff]   ;;  %v1780_v26 = vld [vmem:[#allocation5 + $0x60] ss:$8 sps:$4 sm:$0xff]  }
  0x41   :  { %v1778_v25 = vld [vmem:[#allocation5 + $0x264] ss:$8 sps:$4 sm:$0xff]   ;;  %v1781_v27 = vld [vmem:[#allocation5 + $0x260] ss:$8 sps:$4 sm:$0xff]   ;;  %v1782_v28 = vld [vmem:[#allocation5 + $0x74] ss:$8 sps:$4 sm:$0xff]  }
  0x42   :  { %1220 = vmatpush1.bf16.msra.mxu1 %v1756_v10  ;;  %v1784_v29 = vld [vmem:[#allocation5 + $0x274] ss:$8 sps:$4 sm:$0xff]   ;;  %v1786_v30 = vld [vmem:[#allocation5 + $0x70] ss:$8 sps:$4 sm:$0xff]   ;;  %v1788_v32 = vld [vmem:[#allocation5 + $0x84] ss:$8 sps:$4 sm:$0xff]  }
  0x43   :  { %1348 = vmatpush1.bf16.msra.mxu0 %v1757_v11  ;;  %1222 = vmatprep.subr.bf16.mxu1 %v1758_v12  ;;  %v1787_v31 = vld [vmem:[#allocation5 + $0x270] ss:$8 sps:$4 sm:$0xff]   ;;  %v1790_v33 = vld [vmem:[#allocation5 + $0x284] ss:$8 sps:$4 sm:$0xff]   ;;  %v1792_v34 = vld [vmem:[#allocation5 + $0x80] ss:$8 sps:$4 sm:$0xff]  }
  0x44   :  { %1350 = vmatprep.subr.bf16.mxu0 %v1760_v13  ;;  %v1793_v35 = vld [vmem:[#allocation5 + $0x280] ss:$8 sps:$4 sm:$0xff]   ;;  %v1794_v36 = vld [vmem:[#allocation5 + $0x94] ss:$8 sps:$4 sm:$0xff]   ;;  %v1798_v38 = vld [vmem:[#allocation5 + $0x90] ss:$8 sps:$4 sm:$0xff]  }
  0x45   :  { %v1796_v37 = vld [vmem:[#allocation5 + $0x294] ss:$8 sps:$4 sm:$0xff]   ;;  %v1799_v39 = vld [vmem:[#allocation5 + $0x290] ss:$8 sps:$4 sm:$0xff]   ;;  %v1800_v40 = vld [vmem:[#allocation5 + $0xa4] ss:$8 sps:$4 sm:$0xff]  }
  0x46   :  { %1224 = vmatpush1.bf16.msra.mxu1 %v1762_v14  ;;  %v1802_v41 = vld [vmem:[#allocation5 + $0x2a4] ss:$8 sps:$4 sm:$0xff]   ;;  %v1804_v42 = vld [vmem:[#allocation5 + $0xa0] ss:$8 sps:$4 sm:$0xff]   ;;  %v1806_v44 = vld [vmem:[#allocation5 + $0xb4] ss:$8 sps:$4 sm:$0xff]  }
  0x47   :  { %1352 = vmatpush1.bf16.msra.mxu0 %v1763_v15  ;;  %1226 = vmatprep.subr.bf16.mxu1 %v1764_v16  ;;  %v1805_v43 = vld [vmem:[#allocation5 + $0x2a0] ss:$8 sps:$4 sm:$0xff]   ;;  %v1808_v45 = vld [vmem:[#allocation5 + $0x2b4] ss:$8 sps:$4 sm:$0xff]   ;;  %v1810_v47 = vld [vmem:[#allocation5 + $0xb0] ss:$8 sps:$4 sm:$0xff]  }
  0x48   :  { %1354 = vmatprep.subr.bf16.mxu0 %v1766_v17  ;;  %v64_v46 = vld [vmem:[#allocation2 + $0x8] sm:$0xff]  ;;  %v1812_v50 = vld [vmem:[#allocation5 + $0xc4] ss:$8 sps:$4 sm:$0xff]   ;;  %v1816_v52 = vld [vmem:[#allocation5 + $0xc0] ss:$8 sps:$4 sm:$0xff]   ;;  %s2105_s12 = smov [#allocation9]  }
  0x49   :  { %629 = vmatprep.mubr.f32.mxu1 %v64_v46  ;;  %v1811_v48 = vld [vmem:[#allocation5 + $0x2b0] ss:$8 sps:$4 sm:$0xff]   ;;  %v1814_v51 = vld [vmem:[#allocation5 + $0x2c4] ss:$8 sps:$4 sm:$0xff]   ;;  %v1817_v53 = vld [vmem:[#allocation5 + $0x2c0] ss:$8 sps:$4 sm:$0xff]  }
  0x4a   :  { %1228 = vmatpush1.bf16.msra.mxu1 %v1768_v18  ;;  %v68_v49 = vld [vmem:[#allocation2 + $0x28] sm:$0xff]  ;;  %v1824_v58 = vld [vmem:[#allocation5 + $0xe4] ss:$8 sps:$4 sm:$0xff]   ;;  %v1828_v60 = vld [vmem:[#allocation5 + $0xe0] ss:$8 sps:$4 sm:$0xff]   ;;  %s1080_s13 = sshll.u32 %s2105_s12, 4  ;;  %s1081_s13 = int_to_ptr.vmem [resolvable:$true] %s1080_s13 }
  0x4b   :  { %1356 = vmatpush1.bf16.msra.mxu0 %v1769_v19  ;;  %1230 = vmatprep.subr.bf16.mxu1 %v1770_v20  ;;  %v1818_v54 = vld [vmem:[#allocation5 + $0xd4] ss:$8 sps:$4 sm:$0xff]   ;;  %v1822_v56 = vld [vmem:[#allocation5 + $0xd0] ss:$8 sps:$4 sm:$0xff]   ;;  %v1826_v59 = vld [vmem:[#allocation5 + $0x2e4] ss:$8 sps:$4 sm:$0xff]   ;;  %p2051_p11 = scmp.lt.s32.totalorder %s1081_s13, %s1081_s13 }
  0x4c   :  { %1358 = vmatprep.subr.bf16.mxu0 %v1772_v21  ;;  %771 = vmatprep.mubr.f32.mxu0 %v68_v49  ;;  %v1820_v55 = vld [vmem:[#allocation5 + $0x2d4] ss:$8 sps:$4 sm:$0xff]   ;;  %v1823_v57 = vld [vmem:[#allocation5 + $0x2d0] ss:$8 sps:$4 sm:$0xff]   ;;  %v1829_v61 = vld [vmem:[#allocation5 + $0x2e0] ss:$8 sps:$4 sm:$0xff]  }
  0x4d   :  { %v1830_v62 = vld [vmem:[#allocation5 + $0xf4] ss:$8 sps:$4 sm:$0xff]   ;;  %v1834_v0 = vld [vmem:[#allocation5 + $0xf0] ss:$8 sps:$4 sm:$0xff]   ;;  %v1836_v2 = vld [vmem:[#allocation5 + $0x104] ss:$8 sps:$4 sm:$0xff]  }
  0x4e   :  { %1232 = vmatpush1.bf16.msra.mxu1 %v1774_v22  ;;  %v1832_v63 = vld [vmem:[#allocation5 + $0x2f4] ss:$8 sps:$4 sm:$0xff]   ;;  %v1835_v1 = vld [vmem:[#allocation5 + $0x2f0] ss:$8 sps:$4 sm:$0xff]   ;;  %v1839_v3 = vld [vmem:[#allocation5 + $0x304] ss:$8 sps:$4 sm:$0xff]  }
  0x4f   :  { %1360 = vmatpush1.bf16.msra.mxu0 %v1775_v23  ;;  %1234 = vmatprep.subr.bf16.mxu1 %v1776_v24  ;;  %v1838_v4 = vld [vmem:[#allocation5 + $0x100] ss:$8 sps:$4 sm:$0xff]   ;;  %v63_v6 = vld [vmem:[#allocation2] sm:$0xff]  ;;  %v1848_v12 = vld [vmem:[#allocation5 + $0x124] ss:$8 sps:$4 sm:$0xff]   ;;  %s2046_s14 = scalar_lea.vmem %s1081_s13, 256 }
  0x50   :  { %1362 = vmatprep.subr.bf16.mxu0 %v1778_v25  ;;  %v1841_v5 = vld [vmem:[#allocation5 + $0x300] ss:$8 sps:$4 sm:$0xff]   ;;  %v67_v7 = vld [vmem:[#allocation2 + $0x20] sm:$0xff]  ;;  %v1851_v13 = vld [vmem:[#allocation5 + $0x324] ss:$8 sps:$4 sm:$0xff]   ;;  %p2047_p10 = scmp.ne.s32.totalorder %s1081_s13, %s2046_s14  ;;  %p2052_p12 = scmp.lt.s32.totalorder %s2046_s14, %s2046_s14 }
  0x51   :  { %v1842_v8 = vld [vmem:[#allocation5 + $0x114] ss:$8 sps:$4 sm:$0xff]   ;;  %v1844_v10 = vld [vmem:[#allocation5 + $0x110] ss:$8 sps:$4 sm:$0xff]   ;;  %v1850_v14 = vld [vmem:[#allocation5 + $0x120] ss:$8 sps:$4 sm:$0xff]  }
  0x52   :  { %1236 = vmatpush1.bf16.msra.mxu1 %v1780_v26  ;;  %v1845_v9 = vld [vmem:[#allocation5 + $0x314] ss:$8 sps:$4 sm:$0xff]   ;;  %v1847_v11 = vld [vmem:[#allocation5 + $0x310] ss:$8 sps:$4 sm:$0xff]   ;;  %v1853_v15 = vld [vmem:[#allocation5 + $0x320] ss:$8 sps:$4 sm:$0xff]   ;;  %p2053_p13 = por %p2052_p12, %p2051_p11 }
  0x53   :  { %1364 = vmatpush1.bf16.msra.mxu0 %v1781_v27  ;;  %1238 = vmatprep.subr.bf16.mxu1 %v1782_v28  ;;  %v1854_v16 = vld [vmem:[#allocation5 + $0x134] ss:$8 sps:$4 sm:$0xff]   ;;  %v1856_v18 = vld [vmem:[#allocation5 + $0x130] ss:$8 sps:$4 sm:$0xff]   ;;  %v1860_v20 = vld [vmem:[#allocation5 + $0x144] ss:$8 sps:$4 sm:$0xff]  }
  0x54   :  { %1366 = vmatprep.subr.bf16.mxu0 %v1784_v29  ;;  %v1857_v17 = vld [vmem:[#allocation5 + $0x334] ss:$8 sps:$4 sm:$0xff]   ;;  %v1859_v19 = vld [vmem:[#allocation5 + $0x330] ss:$8 sps:$4 sm:$0xff]   ;;  %v1863_v21 = vld [vmem:[#allocation5 + $0x344] ss:$8 sps:$4 sm:$0xff]   ;;  %p2054_p0 = pnand %p2053_p13, %p2047_p10 }
  0x55   :  { %v1862_v22 = vld [vmem:[#allocation5 + $0x140] ss:$8 sps:$4 sm:$0xff]   ;;  %v1866_v24 = vld [vmem:[#allocation5 + $0x154] ss:$8 sps:$4 sm:$0xff]   ;;  %v1868_v26 = vld [vmem:[#allocation5 + $0x150] ss:$8 sps:$4 sm:$0xff]  }
  0x56   :  { %1240 = vmatpush1.bf16.msra.mxu1 %v1786_v30  ;;  %v1865_v23 = vld [vmem:[#allocation5 + $0x340] ss:$8 sps:$4 sm:$0xff]   ;;  %v1869_v25 = vld [vmem:[#allocation5 + $0x354] ss:$8 sps:$4 sm:$0xff]   ;;  %v1871_v27 = vld [vmem:[#allocation5 + $0x350] ss:$8 sps:$4 sm:$0xff]  }
  0x57   :  { %1368 = vmatpush1.bf16.msra.mxu0 %v1787_v31  ;;  %1242 = vmatprep.subr.bf16.mxu1 %v1788_v32  ;;  %v1872_v28 = vld [vmem:[#allocation5 + $0x164] ss:$8 sps:$4 sm:$0xff]   ;;  %v1874_v31 = vld [vmem:[#allocation5 + $0x160] ss:$8 sps:$4 sm:$0xff]  }
  0x58   :  { %1370 = vmatprep.subr.bf16.mxu0 %v1790_v33  ;;  %v1875_v29 = vld [vmem:[#allocation5 + $0x364] ss:$8 sps:$4 sm:$0xff]   ;;  %v1877_v33 = vld [vmem:[#allocation5 + $0x360] ss:$8 sps:$4 sm:$0xff]  }
  0x59   :  { %v66_v30 = vld [vmem:[#allocation2 + $0x18] sm:$0xff] }
  0x5a   :  { %1244 = vmatpush1.bf16.msra.mxu1 %v1792_v34  ;;  %v70_v32 = vld [vmem:[#allocation2 + $0x38] sm:$0xff]  ;;  %v1878_v34 = vld [vmem:[#allocation5 + $0x174] ss:$8 sps:$4 sm:$0xff]  }
  0x5b   :  { %1372 = vmatpush1.bf16.msra.mxu0 %v1793_v35  ;;  %1246 = vmatprep.subr.bf16.mxu1 %v1794_v36  ;;  %v1881_v35 = vld [vmem:[#allocation5 + $0x374] ss:$8 sps:$4 sm:$0xff]   ;;  %v1880_v36 = vld [vmem:[#allocation5 + $0x170] ss:$8 sps:$4 sm:$0xff]   ;;  %v1896_v46 = vld [vmem:[#allocation5 + $0x1a4] ss:$8 sps:$4 sm:$0xff]  }
  0x5c   :  { %1374 = vmatprep.subr.bf16.mxu0 %v1796_v37  ;;  %v1883_v37 = vld [vmem:[#allocation5 + $0x370] ss:$8 sps:$4 sm:$0xff]   ;;  %v1901_v49 = vld [vmem:[#allocation5 + $0x3a0] ss:$8 sps:$4 sm:$0xff]  }
  0x5e   :  { %1248 = vmatpush1.bf16.msra.mxu1 %v1798_v38  ;;  %v1884_v38 = vld [vmem:[#allocation5 + $0x184] ss:$8 sps:$4 sm:$0xff]  }
  0x5f   :  { %1376 = vmatpush1.bf16.msra.mxu0 %v1799_v39  ;;  %1250 = vmatprep.subr.bf16.mxu1 %v1800_v40  ;;  %v1887_v39 = vld [vmem:[#allocation5 + $0x384] ss:$8 sps:$4 sm:$0xff]   ;;  %v1886_v40 = vld [vmem:[#allocation5 + $0x180] ss:$8 sps:$4 sm:$0xff]  }
  0x60   :  { %1378 = vmatprep.subr.bf16.mxu0 %v1802_v41  ;;  %v1889_v41 = vld [vmem:[#allocation5 + $0x380] ss:$8 sps:$4 sm:$0xff]  }
  0x62   :  { %1252 = vmatpush1.bf16.msra.mxu1 %v1804_v42  ;;  %v1890_v42 = vld [vmem:[#allocation5 + $0x194] ss:$8 sps:$4 sm:$0xff]  }
  0x63   :  { %1380 = vmatpush1.bf16.msra.mxu0 %v1805_v43  ;;  %1254 = vmatprep.subr.bf16.mxu1 %v1806_v44  ;;  %v1893_v43 = vld [vmem:[#allocation5 + $0x394] ss:$8 sps:$4 sm:$0xff]   ;;  %v1892_v44 = vld [vmem:[#allocation5 + $0x190] ss:$8 sps:$4 sm:$0xff]  }
  0x64   :  { %1382 = vmatprep.subr.bf16.mxu0 %v1808_v45  ;;  %v1895_v45 = vld [vmem:[#allocation5 + $0x390] ss:$8 sps:$4 sm:$0xff]  }
  0x66   :  { %1256 = vmatpush1.bf16.msra.mxu1 %v1810_v47  ;;  %v1899_v47 = vld [vmem:[#allocation5 + $0x3a4] ss:$8 sps:$4 sm:$0xff]  }
  0x67   :  { %1384 = vmatpush1.bf16.msra.mxu0 %v1811_v48  ;;  %1258 = vmatprep.subr.bf16.mxu1 %v1812_v50  ;;  %v1898_v48 = vld [vmem:[#allocation5 + $0x1a0] ss:$8 sps:$4 sm:$0xff]   ;;  %v1902_v50 = vld [vmem:[#allocation5 + $0x1b4] ss:$8 sps:$4 sm:$0xff]  }
  0x68   :  { %1386 = vmatprep.subr.bf16.mxu0 %v1814_v51  ;;  %v1905_v51 = vld [vmem:[#allocation5 + $0x3b4] ss:$8 sps:$4 sm:$0xff]  }
  0x6a   :  { %1260 = vmatpush1.bf16.msra.mxu1 %v1816_v52  ;;  %v1904_v52 = vld [vmem:[#allocation5 + $0x1b0] ss:$8 sps:$4 sm:$0xff]  }
  0x6b   :  { %1388 = vmatpush1.bf16.msra.mxu0 %v1817_v53  ;;  %1262 = vmatprep.subr.bf16.mxu1 %v1818_v54  ;;  %v1907_v53 = vld [vmem:[#allocation5 + $0x3b0] ss:$8 sps:$4 sm:$0xff]   ;;  %v1908_v54 = vld [vmem:[#allocation5 + $0x1c4] ss:$8 sps:$4 sm:$0xff]  }
  0x6c   :  { %1390 = vmatprep.subr.bf16.mxu0 %v1820_v55  ;;  %v1911_v55 = vld [vmem:[#allocation5 + $0x3c4] ss:$8 sps:$4 sm:$0xff]  }
  0x6e   :  { %1264 = vmatpush1.bf16.msra.mxu1 %v1822_v56  ;;  %v1910_v56 = vld [vmem:[#allocation5 + $0x1c0] ss:$8 sps:$4 sm:$0xff]  }
  0x6f   :  { %1392 = vmatpush1.bf16.msra.mxu0 %v1823_v57  ;;  %1266 = vmatprep.subr.bf16.mxu1 %v1824_v58  ;;  %v1913_v57 = vld [vmem:[#allocation5 + $0x3c0] ss:$8 sps:$4 sm:$0xff]   ;;  %v1914_v58 = vld [vmem:[#allocation5 + $0x1d4] ss:$8 sps:$4 sm:$0xff]  }
  0x70   :  { %1394 = vmatprep.subr.bf16.mxu0 %v1826_v59  ;;  %v1917_v59 = vld [vmem:[#allocation5 + $0x3d4] ss:$8 sps:$4 sm:$0xff]  }
  0x72   :  { %1268 = vmatpush1.bf16.msra.mxu1 %v1828_v60  ;;  %v1916_v60 = vld [vmem:[#allocation5 + $0x1d0] ss:$8 sps:$4 sm:$0xff]  }
  0x73   :  { %1396 = vmatpush1.bf16.msra.mxu0 %v1829_v61  ;;  %1270 = vmatprep.subr.bf16.mxu1 %v1830_v62  ;;  %v1919_v61 = vld [vmem:[#allocation5 + $0x3d0] ss:$8 sps:$4 sm:$0xff]   ;;  %v1920_v62 = vld [vmem:[#allocation5 + $0x1e4] ss:$8 sps:$4 sm:$0xff]  }
  0x74   :  { %1398 = vmatprep.subr.bf16.mxu0 %v1832_v63  ;;  %v1923_v63 = vld [vmem:[#allocation5 + $0x3e4] ss:$8 sps:$4 sm:$0xff]  }
  0x76   :  { %1272 = vmatpush1.bf16.msra.mxu1 %v1834_v0  ;;  %v1922_v0 = vld [vmem:[#allocation5 + $0x1e0] ss:$8 sps:$4 sm:$0xff]  }
  0x77   :  { %1400 = vmatpush1.bf16.msra.mxu0 %v1835_v1  ;;  %1274 = vmatprep.subr.bf16.mxu1 %v1836_v2  ;;  %v1925_v1 = vld [vmem:[#allocation5 + $0x3e0] ss:$8 sps:$4 sm:$0xff]   ;;  %v1926_v2 = vld [vmem:[#allocation5 + $0x1f4] ss:$8 sps:$4 sm:$0xff]  }
  0x78   :  { %1402 = vmatprep.subr.bf16.mxu0 %v1839_v3  ;;  %v1929_v3 = vld [vmem:[#allocation5 + $0x3f4] ss:$8 sps:$4 sm:$0xff]  }
  0x79   :  { %630 = vmatmul.mubr.f32.vlgmr.msra.gmra.mrb[0].mxu1 %v63_v6  ;;  %v1932_v6 = vld [vmem:[#allocation5 + $0x404] ss:$8 sps:$4 sm:$0xff]  }
  0x7a   :  { %772 = vmatmul.mubr.f32.vlgmr.msra.gmra.mrb[0].mxu0 %v67_v7  ;;  %1276 = vmatpush1.bf16.msra.mxu1 %v1838_v4  ;;  %v1928_v4 = vld [vmem:[#allocation5 + $0x1f0] ss:$8 sps:$4 sm:$0xff]   ;;  %v65_v7 = vld [vmem:[#allocation2 + $0x10] sm:$0xff] }
  0x7b   :  { %1404 = vmatpush1.bf16.msra.mxu0 %v1841_v5  ;;  %1278 = vmatprep.subr.bf16.mxu1 %v1842_v8  ;;  %v1931_v5 = vld [vmem:[#allocation5 + $0x3f0] ss:$8 sps:$4 sm:$0xff]   ;;  %v1934_v8 = vld [vmem:[#allocation5 + $0x400] ss:$8 sps:$4 sm:$0xff]  }
  0x7c   :  { %1406 = vmatprep.subr.bf16.mxu0 %v1845_v9  ;;  %700 = vmatprep.mubr.f32.mxu1 %v66_v30  ;;  %v69_v9 = vld [vmem:[#allocation2 + $0x30] sm:$0xff] }
  0x7d   :  { %842 = vmatprep.mubr.f32.mxu0 %v70_v32  ;;  %v1964_v30 = vld [vmem:[#allocation5 + $0x4a0] ss:$8 sps:$4 sm:$0xff]   ;;  %v1967_v32 = vld [vmem:[#allocation5 + $0x4b0] ss:$8 sps:$4 sm:$0xff]  }
  0x7e   :  { %1280 = vmatpush1.bf16.msra.mxu1 %v1844_v10  ;;  %v1935_v10 = vld [vmem:[#allocation5 + $0x414] ss:$8 sps:$4 sm:$0xff]  }
  0x7f   :  { %1408 = vmatpush1.bf16.msra.mxu0 %v1847_v11  ;;  %1282 = vmatprep.subr.bf16.mxu1 %v1848_v12  ;;  %v72_v11 = vld [vmem:[#allocation2 + $0x48] sm:$0xff] }
  0x80   :  { %1410 = vmatprep.subr.bf16.mxu0 %v1851_v13  ;;  %v1937_v12 = vld [vmem:[#allocation5 + $0x410] ss:$8 sps:$4 sm:$0xff]   ;;  %v1938_v13 = vld [vmem:[#allocation5 + $0x424] ss:$8 sps:$4 sm:$0xff]  }
  0x82   :  { %1284 = vmatpush1.bf16.msra.mxu1 %v1850_v14  ;;  %v1940_v14 = vld [vmem:[#allocation5 + $0x420] ss:$8 sps:$4 sm:$0xff]  }
  0x83   :  { %1412 = vmatpush1.bf16.msra.mxu0 %v1853_v15  ;;  %1286 = vmatprep.subr.bf16.mxu1 %v1854_v16  ;;  %v1941_v15 = vld [vmem:[#allocation5 + $0x434] ss:$8 sps:$4 sm:$0xff]   ;;  %v1943_v16 = vld [vmem:[#allocation5 + $0x430] ss:$8 sps:$4 sm:$0xff]  }
  0x84   :  { %1414 = vmatprep.subr.bf16.mxu0 %v1857_v17  ;;  %v1944_v17 = vld [vmem:[#allocation5 + $0x444] ss:$8 sps:$4 sm:$0xff]  }
  0x86   :  { %1288 = vmatpush1.bf16.msra.mxu1 %v1856_v18  ;;  %v1946_v18 = vld [vmem:[#allocation5 + $0x440] ss:$8 sps:$4 sm:$0xff]  }
  0x87   :  { %1416 = vmatpush1.bf16.msra.mxu0 %v1859_v19  ;;  %1290 = vmatprep.subr.bf16.mxu1 %v1860_v20  ;;  %v1947_v19 = vld [vmem:[#allocation5 + $0x454] ss:$8 sps:$4 sm:$0xff]   ;;  %v1949_v20 = vld [vmem:[#allocation5 + $0x450] ss:$8 sps:$4 sm:$0xff]  }
  0x88   :  { %1418 = vmatprep.subr.bf16.mxu0 %v1863_v21  ;;  %v1950_v21 = vld [vmem:[#allocation5 + $0x464] ss:$8 sps:$4 sm:$0xff]  }
  0x8a   :  { %1292 = vmatpush1.bf16.msra.mxu1 %v1862_v22  ;;  %v1952_v22 = vld [vmem:[#allocation5 + $0x460] ss:$8 sps:$4 sm:$0xff]  }
  0x8b   :  { %1420 = vmatpush1.bf16.msra.mxu0 %v1865_v23  ;;  %1294 = vmatprep.subr.bf16.mxu1 %v1866_v24  ;;  %v1953_v23 = vld [vmem:[#allocation5 + $0x474] ss:$8 sps:$4 sm:$0xff]   ;;  %v1955_v24 = vld [vmem:[#allocation5 + $0x470] ss:$8 sps:$4 sm:$0xff]  }
  0x8c   :  { %1422 = vmatprep.subr.bf16.mxu0 %v1869_v25  ;;  %v1956_v25 = vld [vmem:[#allocation5 + $0x484] ss:$8 sps:$4 sm:$0xff]  }
  0x8e   :  { %1296 = vmatpush1.bf16.msra.mxu1 %v1868_v26  ;;  %v1958_v26 = vld [vmem:[#allocation5 + $0x480] ss:$8 sps:$4 sm:$0xff]  }
  0x8f   :  { %1424 = vmatpush1.bf16.msra.mxu0 %v1871_v27  ;;  %1298 = vmatprep.subr.bf16.mxu1 %v1872_v28  ;;  %v1959_v27 = vld [vmem:[#allocation5 + $0x494] ss:$8 sps:$4 sm:$0xff]   ;;  %v1961_v28 = vld [vmem:[#allocation5 + $0x490] ss:$8 sps:$4 sm:$0xff]  }
  0x90   :  { %1426 = vmatprep.subr.bf16.mxu0 %v1875_v29  ;;  %v1962_v29 = vld [vmem:[#allocation5 + $0x4a4] ss:$8 sps:$4 sm:$0xff]  }
  0x92   :  { %1300 = vmatpush1.bf16.msra.mxu1 %v1874_v31  ;;  %v1965_v31 = vld [vmem:[#allocation5 + $0x4b4] ss:$8 sps:$4 sm:$0xff]  }
  0x93   :  { %1428 = vmatpush1.bf16.msra.mxu0 %v1877_v33  ;;  %1302 = vmatprep.subr.bf16.mxu1 %v1878_v34  ;;  %v1968_v33 = vld [vmem:[#allocation5 + $0x4c4] ss:$8 sps:$4 sm:$0xff]   ;;  %v1970_v34 = vld [vmem:[#allocation5 + $0x4c0] ss:$8 sps:$4 sm:$0xff]  }
  0x94   :  { %1430 = vmatprep.subr.bf16.mxu0 %v1881_v35  ;;  %v1971_v35 = vld [vmem:[#allocation5 + $0x4d4] ss:$8 sps:$4 sm:$0xff]  }
  0x96   :  { %1304 = vmatpush1.bf16.msra.mxu1 %v1880_v36  ;;  %v1973_v36 = vld [vmem:[#allocation5 + $0x4d0] ss:$8 sps:$4 sm:$0xff]  }
  0x97   :  { %1432 = vmatpush1.bf16.msra.mxu0 %v1883_v37  ;;  %1306 = vmatprep.subr.bf16.mxu1 %v1884_v38  ;;  %v1974_v37 = vld [vmem:[#allocation5 + $0x4e4] ss:$8 sps:$4 sm:$0xff]   ;;  %v1976_v38 = vld [vmem:[#allocation5 + $0x4e0] ss:$8 sps:$4 sm:$0xff]  }
  0x98   :  { %1434 = vmatprep.subr.bf16.mxu0 %v1887_v39  ;;  %v1977_v39 = vld [vmem:[#allocation5 + $0x4f4] ss:$8 sps:$4 sm:$0xff]  }
  0x9a   :  { %1308 = vmatpush1.bf16.msra.mxu1 %v1886_v40  ;;  %v1979_v40 = vld [vmem:[#allocation5 + $0x4f0] ss:$8 sps:$4 sm:$0xff]  }
  0x9b   :  { %1436 = vmatpush1.bf16.msra.mxu0 %v1889_v41  ;;  %1310 = vmatprep.subr.bf16.mxu1 %v1890_v42  ;;  %v71_v41 = vld [vmem:[#allocation2 + $0x40] sm:$0xff]  ;;  %v1166_v42 = vld [vmem:[#allocation7 + $0x40] sm:$0xff]  }
  0x9c   :  { %1438 = vmatprep.subr.bf16.mxu0 %v1893_v43  ;;  %v1096_v43 = vld [vmem:[#allocation7] sm:$0xff]  }
  0x9e   :  { %1312 = vmatpush1.bf16.msra.mxu1 %v1892_v44  ;;  %v1167_v44 = vld [vmem:[#allocation7 + $0x48] sm:$0xff]  }
  0x9f   :  { %1440 = vmatpush1.bf16.msra.mxu0 %v1895_v45  ;;  %1314 = vmatprep.subr.bf16.mxu1 %v1896_v46  ;;  %v1159_v45 = vld [vmem:[#allocation7 + $0x8] sm:$0xff]   ;;  %v1168_v46 = vld [vmem:[#allocation7 + $0x50] sm:$0xff]  }
  0xa0   :  { %1442 = vmatprep.subr.bf16.mxu0 %v1899_v47  ;;  %v1160_v47 = vld [vmem:[#allocation7 + $0x10] sm:$0xff]  }
  0xa2   :  { %1316 = vmatpush1.bf16.msra.mxu1 %v1898_v48  ;;  %v1169_v48 = vld [vmem:[#allocation7 + $0x58] sm:$0xff]  }
  0xa3   :  { %1444 = vmatpush1.bf16.msra.mxu0 %v1901_v49  ;;  %1318 = vmatprep.subr.bf16.mxu1 %v1902_v50  ;;  %v1161_v49 = vld [vmem:[#allocation7 + $0x18] sm:$0xff]   ;;  %v1170_v50 = vld [vmem:[#allocation7 + $0x60] sm:$0xff]  }
  0xa4   :  { %1446 = vmatprep.subr.bf16.mxu0 %v1905_v51  ;;  %v1162_v51 = vld [vmem:[#allocation7 + $0x20] sm:$0xff]  }
  0xa6   :  { %1320 = vmatpush1.bf16.msra.mxu1 %v1904_v52  ;;  %v1171_v52 = vld [vmem:[#allocation7 + $0x68] sm:$0xff]  }
  0xa7   :  { %1448 = vmatpush1.bf16.msra.mxu0 %v1907_v53  ;;  %1322 = vmatprep.subr.bf16.mxu1 %v1908_v54  ;;  %v1163_v53 = vld [vmem:[#allocation7 + $0x28] sm:$0xff]   ;;  %v1172_v54 = vld [vmem:[#allocation7 + $0x70] sm:$0xff]  }
  0xa8   :  { %1450 = vmatprep.subr.bf16.mxu0 %v1911_v55  ;;  %v1164_v55 = vld [vmem:[#allocation7 + $0x30] sm:$0xff]  }
  0xaa   :  { %1324 = vmatpush1.bf16.msra.mxu1 %v1910_v56  ;;  %v1173_v56 = vld [vmem:[#allocation7 + $0x78] sm:$0xff]  }
  0xab   :  { %1452 = vmatpush1.bf16.msra.mxu0 %v1913_v57  ;;  %1326 = vmatprep.subr.bf16.mxu1 %v1914_v58  ;;  %v1165_v57 = vld [vmem:[#allocation7 + $0x38] sm:$0xff]  }
  0xac   :  { %1454 = vmatprep.subr.bf16.mxu0 %v1917_v59 }
  0xae   :  { %1328 = vmatpush1.bf16.msra.mxu1 %v1916_v60  ;;  %v555_v60 = vlaneseq }
  0xaf   :  { %1456 = vmatpush1.bf16.msra.mxu0 %v1919_v61  ;;  %1330 = vmatprep.subr.bf16.mxu1 %v1920_v62 }
  0xb0   :  { %1458 = vmatprep.subr.bf16.mxu0 %v1923_v63  ;;  %v556_v61 = vshrl.u32 %v555_v60, 7  ;;  %v553_v63 = vld [vmem:[%s2210_s2] sm:$0x3] }
  0xb2   :  { %1332 = vmatpush1.bf16.msra.mxu1 %v1922_v0  ;;  %v557_v62 = vsub.s32 0, %v556_v61  ;;  %v561_v0 = vsub.s32 1, %v556_v61 }
  0xb3   :  { %1460 = vmatpush1.bf16.msra.mxu0 %v1925_v1  ;;  %1334 = vmatprep.subr.bf16.mxu1 %v1926_v2 }
  0xb4   :  { %1462 = vmatprep.subr.bf16.mxu0 %v1929_v3  ;;  %v558_v1 = vrot.slane %v553_v63, %v557_v62  ;;  %v562_v2 = vrot.slane %v553_v63, %v561_v0 }
  0xb6   :  { %1336 = vmatpush1.bf16.msra.mxu1 %v1928_v4 }
  0xb7   :  { %1464 = vmatpush1.bf16.msra.mxu0 %v1931_v5  ;;  %1530 = vmatprep.subr.bf16.mxu1 %v1166_v42 }
  0xb8   :  { %1466 = vmatprep.subr.bf16.mxu0 %v1932_v6 }
  0xb9   :  { %701 = vmatmul.mubr.f32.vlgmr.msra.gmra.mrb[0].mxu1 %v65_v7 }
  0xba   :  { %843 = vmatmul.mubr.f32.vlgmr.msra.gmra.mrb[0].mxu0 %v69_v9  ;;  %1532 = vmatpush3.bf16.msra.mxu1 %v1096_v43 }
  0xbb   :  { %1468 = vmatpush1.bf16.msra.mxu0 %v1934_v8  ;;  %913 = vmatprep.mubr.f32.mxu0 %v72_v11 }
  0xbc   :  { %1470 = vmatprep.subr.bf16.mxu0 %v1935_v10  ;;  %1534 = vmatprep.subr.bf16.mxu1 %v1167_v44 }
  0xbe   :  { %1536 = vmatpush3.bf16.msra.mxu1 %v1159_v45 }
  0xbf   :  { %1472 = vmatpush1.bf16.msra.mxu0 %v1937_v12  ;;  %1538 = vmatprep.subr.bf16.mxu1 %v1168_v46 }
  0xc0   :  { %1474 = vmatprep.subr.bf16.mxu0 %v1938_v13 }
  0xc2   :  { %1540 = vmatpush3.bf16.msra.mxu1 %v1160_v47 }
  0xc3   :  { %1476 = vmatpush1.bf16.msra.mxu0 %v1940_v14  ;;  %1542 = vmatprep.subr.bf16.mxu1 %v1169_v48 }
  0xc4   :  { %1478 = vmatprep.subr.bf16.mxu0 %v1941_v15 }
  0xc6   :  { %1544 = vmatpush3.bf16.msra.mxu1 %v1161_v49 }
  0xc7   :  { %1480 = vmatpush1.bf16.msra.mxu0 %v1943_v16  ;;  %1546 = vmatprep.subr.bf16.mxu1 %v1170_v50 }
  0xc8   :  { %1482 = vmatprep.subr.bf16.mxu0 %v1944_v17 }
  0xca   :  { %1548 = vmatpush3.bf16.msra.mxu1 %v1162_v51 }
  0xcb   :  { %1484 = vmatpush1.bf16.msra.mxu0 %v1946_v18  ;;  %1550 = vmatprep.subr.bf16.mxu1 %v1171_v52 }
  0xcc   :  { %1486 = vmatprep.subr.bf16.mxu0 %v1947_v19 }
  0xce   :  { %1552 = vmatpush3.bf16.msra.mxu1 %v1163_v53 }
  0xcf   :  { %1488 = vmatpush1.bf16.msra.mxu0 %v1949_v20  ;;  %1554 = vmatprep.subr.bf16.mxu1 %v1172_v54 }
  0xd0   :  { %1490 = vmatprep.subr.bf16.mxu0 %v1950_v21 }
  0xd2   :  { %1556 = vmatpush3.bf16.msra.mxu1 %v1164_v55 }
  0xd3   :  { %1492 = vmatpush1.bf16.msra.mxu0 %v1952_v22  ;;  %1558 = vmatprep.subr.bf16.mxu1 %v1173_v56 }
  0xd4   :  { %1494 = vmatprep.subr.bf16.mxu0 %v1953_v23 }
  0xd6   :  { %1560 = vmatpush3.bf16.msra.mxu1 %v1165_v57 }
  0xd7   :  { %1496 = vmatpush1.bf16.msra.mxu0 %v1955_v24 }
  0xd8   :  { %1498 = vmatprep.subr.bf16.mxu0 %v1956_v25 }
  0xdb   :  { %1500 = vmatpush1.bf16.msra.mxu0 %v1958_v26 }
  0xdc   :  { %1502 = vmatprep.subr.bf16.mxu0 %v1959_v27 }
  0xdf   :  { %1504 = vmatpush1.bf16.msra.mxu0 %v1961_v28 }
  0xe0   :  { %1506 = vmatprep.subr.bf16.mxu0 %v1962_v29 }
  0xe3   :  { %1508 = vmatpush1.bf16.msra.mxu0 %v1964_v30 }
  0xe4   :  { %1510 = vmatprep.subr.bf16.mxu0 %v1965_v31 }
  0xe7   :  { %1512 = vmatpush1.bf16.msra.mxu0 %v1967_v32 }
  0xe8   :  { %1514 = vmatprep.subr.bf16.mxu0 %v1968_v33 }
  0xeb   :  { %1516 = vmatpush1.bf16.msra.mxu0 %v1970_v34 }
  0xec   :  { %1518 = vmatprep.subr.bf16.mxu0 %v1971_v35 }
  0xef   :  { %1520 = vmatpush1.bf16.msra.mxu0 %v1973_v36 }
  0xf0   :  { %1522 = vmatprep.subr.bf16.mxu0 %v1974_v37 }
  0xf3   :  { %1524 = vmatpush1.bf16.msra.mxu0 %v1976_v38 }
  0xf4   :  { %1526 = vmatprep.subr.bf16.mxu0 %v1977_v39 }
  0xf7   :  { %1528 = vmatpush1.bf16.msra.mxu0 %v1979_v40 }
  0xfa   :  { %914 = vmatmul.mubr.f32.vlgmr.msra.gmra.mrb[0].mxu0 %v71_v41 }
 0x18c   :  { %v702_v58 = vpop.f32.mrb[0].mxu1 }
 0x18d   :  { %v704_v59 = vpop.f32.mrb[1].mxu1  ;;  %v1561_v3 = vadd.f32 %v702_v58, %v558_v1 }
 0x18e   :  { %v1563_v4 = vadd.f32 %v704_v59, %v562_v2 }
 0x1cd   :  { %v915_v5 = vpop.f32.mrb[0].mxu0 }
 0x1ce   :  { %v1562_v6 = vadd.f32 %v1561_v3, %v915_v5  ;;  %v917_v7 = vpop.f32.mrb[1].mxu0 }
 0x1cf   :  { %v1564_v8 = vadd.f32 %v1563_v4, %v917_v7 }
 0x1d0   :  { %920 = vst [vmem:[#allocation9] sm:$0xff] %v1562_v6 }
 0x1d1   :  { %921 = vst [vmem:[#allocation9 + $0x8] sm:$0xff] %v1564_v8  ;;  %1057 = vmatprep.mubr.f32.mxu1 %v1564_v8 }
 0x1d2   :  { %1058 = vmatmul.mubr.f32.vlgmr.msra.gmra.mrb[2].mxu1 %v1562_v6 }
 0x1d3   :  { %2057 = shalt.err (!%p2054_p0)
}
 0x1d4   :  { %s2058_s16 = scalar_lea.hbm %s2214_s6, 256 }
 0x1d5   :  { %p2059_p1 = scmp.ne.s32.totalorder %s2214_s6, %s2058_s16  ;;  %p2062_p2 = scmp.lt.u32.totalorder %s2058_s16, %s2214_s6 }
 0x1d7   :  { %p2064_p3 = pnand %p2062_p2, %p2059_p1 }
 0x1d9   :  { %2067 = shalt.err (!%p2064_p3)
}
 0x1da   :  { %1083 = dma.vmem_to_hbm [thread:$0]  %s1081_s13, 256, %s2214_s6, [#allocation10]   ;;  %v1094_v10 = vld [vmem:[%s2212_s4] ss:$0 sm:$0xff] }
 0x1db   :  { %s2106_s24 = smov [#allocation8]  }
 0x1dc   :  { %s1070_s25 = sshll.u32 %s2106_s24, 4  ;;  %s1071_s25 = int_to_ptr.vmem [resolvable:$true] %s1070_s25 }
 0x1dd   :  { %s2068_s26 = scalar_lea.vmem %s1071_s25, 128  ;;  %p2073_p5 = scmp.lt.s32.totalorder %s1071_s25, %s1071_s25 }
 0x1de   :  { %p2069_p4 = scmp.ne.s32.totalorder %s1071_s25, %s2068_s26  ;;  %p2074_p6 = scmp.lt.s32.totalorder %s2068_s26, %s2068_s26 }
 0x1e0   :  { %p2075_p7 = por %p2074_p6, %p2073_p5 }
 0x1e2   :  { %p2076_p8 = pnand %p2075_p7, %p2069_p4 }
 0x2a5   :  { %v1206_v9 = vpop.f32.mrb[2].mxu1 }
 0x2a6   :  { %v1207_v11 = vpop.f32.mrb[3].mxu1 }
 0x2a7   :  { %v1208_v12 = vadd.f32 %v1207_v11, %v1206_v9 }
 0x2a9   :  { %v1060_v13 = vadd.f32 %v1208_v12, %v1094_v10 }
 0x2ab   :  { %1063 = vst [vmem:[#allocation8] sm:$0xff] %v1060_v13 }
 0x2ac   :  { %2079 = shalt.err (!%p2076_p8)
}
 0x2ad   :  { %s2080_s28 = scalar_lea.hbm %s2213_s5, 128 }
 0x2ae   :  { %p2081_p9 = scmp.ne.s32.totalorder %s2213_s5, %s2080_s28  ;;  %p2084_p10 = scmp.lt.u32.totalorder %s2080_s28, %s2213_s5 }
 0x2b0   :  { %p2086_p11 = pnand %p2084_p10, %p2081_p9 }
 0x2b2   :  { %2089 = shalt.err (!%p2086_p11)
}
 0x2b3   :  { %1073 = dma.vmem_to_hbm [thread:$0]  %s1071_s25, 128, %s2213_s5, [#allocation4]  }
 0x2b4   :  { %2094 = dma.done.wait [#allocation4], 128  }
 0x2b5   :  { %2095 = vsyncadd [#allocation4], 4294967168 }
 0x2b6   :  { %2096 = dma.done.wait [#allocation10], 256  }
 0x2b7   :  { %2097 = vsyncadd [#allocation10], 4294967040 }
 0x2b8   :  { %1090 = vsyncpa [#allocation3], 1 }
 0x2b9   :  { %1091 = vsyncpa [#allocation6], 1 }
 0x2ba   :  { %1092 = vsyncpa [#allocation4], 1 }
 0x2bb   :  { %1093 = vsyncpa [#allocation10], 1 }

</bundles_post_ra>
